<compile_context>
chip_gen: v6e
topology: v6e:2x2x1
jax: 0.10.0
libtpu: 0.0.40
codegen_flags: <defaults>
</compile_context>

<pallas_src>
import functools
from typing import NamedTuple

import jax
import jax.numpy as jnp
from jax.experimental import pallas as pl
from jax.experimental.pallas import tpu as pltpu


def _round_up(x, m):
    return (x + m - 1) // m * m


def _device_kind():
    try:
        return jax.devices()[0].device_kind.lower()
    except Exception:
        return ""


def _vmem_budget_bytes():
    """Per-chip VMEM budget with ~20% headroom for compiler internal scratch."""
    cap = None
    try:
        cap = int(pltpu.get_tpu_info().vmem_capacity_bytes)
    except Exception:
        cap = None
    if not cap:
        cap = (64 << 20) if "v7" in _device_kind() else (128 << 20)
    return int(cap * 0.8)


def _row_tile_target():
    """(tm_target, two_tensorcores) per generation (MXU-roofline sizing)."""
    kind = _device_kind()
    if "v7" in kind:
        return 512, True       # ~310 FLOPs/byte needed; 2 TCs/chip
    if "v6" in kind:
        return 1024, False     # ~650 FLOPs/byte needed
    if "v5" in kind:
        return 256, False      # ~240 FLOPs/byte needed
    return 512, False


def _vmem_estimate(tm, tk, d_model_p, n_k, cbytes, obytes):
    wbuf = 3 if n_k > 1 else 2                            # Buffered(3) weights on k-loop path
    est = 2 * tm * d_model_p * cbytes                     # x (double-buffered)
    est += wbuf * d_model_p * tk * cbytes                 # w1 blocks
    est += wbuf * tk * d_model_p * cbytes                 # w2 blocks
    est += wbuf * 8 * tk * 4 + 2 * 8 * d_model_p * 4      # biases (sublane-padded)
    est += 2 * tm * d_model_p * obytes                    # out (double-buffered)
    if n_k > 1:
        est += tm * d_model_p * 4                         # f32 accumulator scratch
    est += tm * tk * (4 + cbytes)                         # h (f32) + bf16 re-cast in body
    return est


class FFNPlan(NamedTuple):
    d_model: int
    d_diff: int
    d_model_p: int
    d_diff_p: int
    tk_ff: int
    n_k: int
    tm_max: int
    sub: int
    two_core: bool
    vmem_limit: int
    compute_dtype: str


def make_ffn_plan(d_model, d_diff, compute_dtype="bfloat16", out_itemsize=4):
    """Choose tiles / VMEM budget once per (d_model, d_diff, dtype)."""
    cdt = jnp.dtype(compute_dtype)
    cbytes = cdt.itemsize
    sub = 16 if cbytes == 2 else 8
    budget = _vmem_budget_bytes()
    tm_target, two_core = _row_tile_target()

    d_model_p = _round_up(d_model, 128)
    d_diff_128 = _round_up(d_diff, 128)

    # Prefer the full hidden dim (removes the reduction axis entirely);
    # otherwise fall back to progressively smaller k chunks.
    tk_cands = [d_diff_128] + [c for c in (2048, 1024, 512, 256, 128)
                               if c < d_diff_128]

    tm = tm_target
    while True:
        for tk in tk_cands:
            d_diff_p = _round_up(d_diff, tk)
            n_k = d_diff_p // tk
            if _vmem_estimate(tm, tk, d_model_p, n_k, cbytes, out_itemsize) <= budget:
                return FFNPlan(d_model=d_model, d_diff=d_diff,
                               d_model_p=d_model_p, d_diff_p=d_diff_p,
                               tk_ff=tk, n_k=n_k, tm_max=tm, sub=sub,
                               two_core=two_core, vmem_limit=budget,
                               compute_dtype=str(cdt))
        if tm <= sub:
            tk = 128
            d_diff_p = _round_up(d_diff, tk)
            return FFNPlan(d_model=d_model, d_diff=d_diff,
                           d_model_p=d_model_p, d_diff_p=d_diff_p,
                           tk_ff=tk, n_k=d_diff_p // tk, tm_max=sub, sub=sub,
                           two_core=two_core, vmem_limit=budget,
                           compute_dtype=str(cdt))
        tm = max(sub, tm // 2)


def prepare_params(w1, b1, w2, b2, plan):
    """One-time weight cast + pad (hoisted out of the per-call hot path).

    Weights are stored transposed vs. PyTorch: w1 (d_model, d_diff),
    w2 (d_diff, d_model), so y = relu(x @ w1 + b1) @ w2 + b2.
    Zero padding is exact: relu(0 + 0) = 0 and zero W2 rows contribute nothing.
    """
    cdt = jnp.dtype(plan.compute_dtype)
    pm = plan.d_model_p - plan.d_model
    pf = plan.d_diff_p - plan.d_diff
    w1p = jnp.pad(w1.astype(cdt), ((0, pm), (0, pf)))
    b1p = jnp.pad(b1.astype(jnp.float32).reshape(1, -1), ((0, 0), (0, pf)))
    w2p = jnp.pad(w2.astype(cdt), ((0, pf), (0, pm)))
    b2p = jnp.pad(b2.astype(jnp.float32).reshape(1, -1), ((0, 0), (0, pm)))
    return w1p, b1p, w2p, b2p


# ----------------------------------------------------------------------------
# Kernels
# ----------------------------------------------------------------------------
def _ffn_kernel_fused(x_ref, w1_ref, b1_ref, w2_ref, b2_ref, o_ref):
    """Single-shot hidden dim: fc1 -> bias+ReLU -> fc2 -> +bias, no k loop."""
    h = jnp.dot(x_ref[...], w1_ref[...], preferred_element_type=jnp.float32)
    h = jnp.maximum(h + b1_ref[...], 0.0)
    # dropout: identity in eval mode.
    y = jnp.dot(h.astype(w2_ref.dtype), w2_ref[...],
                preferred_element_type=jnp.float32) + b2_ref[...]
    o_ref[...] = y.astype(o_ref.dtype)


def _ffn_kernel_acc(x_ref, w1_ref, b1_ref, w2_ref, b2_ref, o_ref, acc_ref):
    """Hidden dim chunked along the trailing 'arbitrary' axis; f32 accumulator."""
    k = pl.program_id(1)

    @pl.when(k == 0)
    def _init():
        # Fold the fc2 bias into the accumulator init (saves a VPU pass later).
        acc_ref[...] = jnp.broadcast_to(b2_ref[...], acc_ref.shape)

    h = jnp.dot(x_ref[...], w1_ref[...], preferred_element_type=jnp.float32)
    h = jnp.maximum(h + b1_ref[...], 0.0)
    acc_ref[...] += jnp.dot(h.astype(w2_ref.dtype), w2_ref[...],
                            preferred_element_type=jnp.float32)

    @pl.when(k == pl.num_programs(1) - 1)
    def _finalize():
        o_ref[...] = acc_ref[...].astype(o_ref.dtype)


def _weight_spec(shape, index_map, n_buf):
    # Deeper weight pipelining hides DMA latency when the k loop is short.
    try:
        return pl.BlockSpec(shape, index_map, pipeline_mode=pl.Buffered(n_buf))
    except TypeError:  # BlockSpec without pipeline_mode support
        return pl.BlockSpec(shape, index_map)


# ----------------------------------------------------------------------------
# Wrapper
# ----------------------------------------------------------------------------
@functools.partial(jax.jit, static_argnames=("plan",))
def ffn_apply(x, w1p, b1p, w2p, b2p, *, plan):
    """x: (batch, seq, d_model) -> fc2(dropout(relu(fc1(x)))), eval mode."""
    batch, seq, d_model = x.shape
    assert d_model == plan.d_model
    out_dtype = x.dtype
    cdt = jnp.dtype(plan.compute_dtype)
    M = batch * seq

    # Per-call row tile: as large as the plan allows; on dual-TC chips keep
    # >= 2 row tiles so the "parallel" axis actually shards across both cores.
    tm = min(plan.tm_max, _round_up(M, plan.sub))
    if plan.two_core and M > plan.sub:
        tm = min(tm, _round_up(-(-M // 2), plan.sub))
    tm = max(tm, plan.sub)
    M_p = _round_up(M, tm)
    n_i = M_p // tm

    x2 = jnp.pad(x.reshape(M, d_model).astype(cdt),
                 ((0, M_p - M), (0, plan.d_model_p - d_model)))

    cbytes = cdt.itemsize
    obytes = jnp.dtype(out_dtype).itemsize
    cost = pl.CostEstimate(
        flops=4 * M_p * plan.d_model_p * plan.d_diff_p,
        transcendentals=0,
        bytes_accessed=int(
            M_p * plan.d_model_p * cbytes                            # x read
            + n_i * (2 * plan.d_model_p * plan.d_diff_p * cbytes     # W1+W2 re-streamed per row tile
                     + (plan.d_diff_p + plan.d_model_p) * 4)         # biases
            + M_p * plan.d_model_p * obytes),                        # out write
    )

    if plan.n_k == 1:
        grid_spec = pltpu.PrefetchScalarGridSpec(
            num_scalar_prefetch=0,
            grid=(n_i,),
            in_specs=[
                pl.BlockSpec((tm, plan.d_model_p), lambda i: (i, 0)),
                pl.BlockSpec((plan.d_model_p, plan.d_diff_p), lambda i: (0, 0)),
                pl.BlockSpec((1, plan.d_diff_p), lambda i: (0, 0)),
                pl.BlockSpec((plan.d_diff_p, plan.d_model_p), lambda i: (0, 0)),
                pl.BlockSpec((1, plan.d_model_p), lambda i: (0, 0)),
            ],
            out_specs=pl.BlockSpec((tm, plan.d_model_p), lambda i: (i, 0)),
            scratch_shapes=[],
        )
        kernel = _ffn_kernel_fused
        dims = ("parallel",)
    else:
        grid_spec = pltpu.PrefetchScalarGridSpec(
            num_scalar_prefetch=0,
            grid=(n_i, plan.n_k),
            in_specs=[
                pl.BlockSpec((tm, plan.d_model_p), lambda i, k: (i, 0)),
                _weight_spec((plan.d_model_p, plan.tk_ff), lambda i, k: (0, k), 3),
                pl.BlockSpec((1, plan.tk_ff), lambda i, k: (0, k)),
                _weight_spec((plan.tk_ff, plan.d_model_p), lambda i, k: (k, 0), 3),
                pl.BlockSpec((1, plan.d_model_p), lambda i, k: (0, 0)),
            ],
            out_specs=pl.BlockSpec((tm, plan.d_model_p), lambda i, k: (i, 0)),
            scratch_shapes=[pltpu.VMEM((tm, plan.d_model_p), jnp.float32)],
        )
        kernel = _ffn_kernel_acc
        dims = ("parallel", "arbitrary")

    out = pl.pallas_call(
        kernel,
        out_shape=jax.ShapeDtypeStruct((M_p, plan.d_model_p), out_dtype),
        grid_spec=grid_spec,
        compiler_params=pltpu.CompilerParams(
            dimension_semantics=dims,
            vmem_limit_bytes=int(plan.vmem_limit),
        ),
        cost_estimate=cost,
    )(x2, w1p, b1p, w2p, b2p)

    return out[:M, :d_model].reshape(batch, seq, d_model)


def positionwise_feed_forward(x, w1, b1, w2, b2, compute_dtype="bfloat16"):
    """Convenience one-shot path. Prefer make_ffn_plan + prepare_params +
    ffn_apply to hoist the per-call weight cast/pad out of the hot path."""
    plan = make_ffn_plan(x.shape[-1], w1.shape[1], compute_dtype)
    return ffn_apply(x, *prepare_params(w1, b1, w2, b2, plan), plan=plan)


def init_params(key, d_model, d_diff, dtype=jnp.float32):
    """Deterministic init mimicking PyTorch nn.Linear defaults
    (uniform(-1/sqrt(fan_in), 1/sqrt(fan_in)))."""
    k1, k2, k3, k4 = jax.random.split(key, 4)
    lim1 = 1.0 / (d_model ** 0.5)
    lim2 = 1.0 / (d_diff ** 0.5)
    # stored transposed relative to PyTorch: (in_features, out_features)
    w1 = jax.random.uniform(k1, (d_model, d_diff), dtype, -lim1, lim1)
    b1 = jax.random.uniform(k2, (d_diff,), dtype, -lim1, lim1)
    w2 = jax.random.uniform(k3, (d_diff, d_model), dtype, -lim2, lim2)
    b2 = jax.random.uniform(k4, (d_model,), dtype, -lim2, lim2)
    return w1, b1, w2, b2


if __name__ == "__main__":
    key = jax.random.PRNGKey(0)
    kx, kp = jax.random.split(key)

    batch, seq, d_model, d_diff = 2, 8, 32, 64
    x = jax.random.normal(kx, (batch, seq, d_model), jnp.float32)
    w1, b1, w2, b2 = init_params(kp, d_model, d_diff)

    # Hoisted weight prep (runs once), then the per-call kernel.
    plan = make_ffn_plan(d_model, d_diff)
    w1p, b1p, w2p, b2p = prepare_params(w1, b1, w2, b2, plan)
    out = ffn_apply(x, w1p, b1p, w2p, b2p, plan=plan)
    out = jax.block_until_ready(out)

    # Reference in plain JAX with matching bf16 MXU inputs / f32 accumulation.
    bf16 = jnp.bfloat16
    h = jnp.maximum(
        jnp.dot(x.astype(bf16), w1.astype(bf16),
                preferred_element_type=jnp.float32) + b1, 0.0)
    ref = jnp.dot(h.astype(bf16), w2.astype(bf16),
                  preferred_element_type=jnp.float32) + b2
    ref = ref.astype(x.dtype)

    assert out.shape == x.shape and out.dtype == x.dtype
    err = float(jnp.max(jnp.abs(out - ref)))
    assert jnp.allclose(out, ref, atol=1e-2, rtol=1e-2), f"max abs err {err}"

    print("KERNEL_OK")
</pallas_src>

<mosaic_0001>
module attributes {stable_mosaic.version = 11 : i64} {
  func.func @_ffn_kernel_fused(%arg0: i32, %arg1: memref<16x128xbf16, #tpu.memory_space<vmem>>, %arg2: memref<128x128xbf16, #tpu.memory_space<vmem>>, %arg3: memref<1x128xf32, #tpu.memory_space<vmem>>, %arg4: memref<128x128xbf16, #tpu.memory_space<vmem>>, %arg5: memref<1x128xf32, #tpu.memory_space<vmem>>, %arg6: memref<16x128xf32, #tpu.memory_space<vmem>>) attributes {dimension_semantics = [#tpu.dimension_semantics<parallel>], iteration_bounds = array<i64: 1>, scalar_prefetch = 0 : i64, scratch_operands = 0 : i64, tpu.core_type = #tpu.core_type<tc>, window_params = [{transform_indices = @transform_0, window_bounds = array<i64: 16, 128>}, {pipeline_mode = #tpu.pipeline_mode<synchronous>, transform_indices = @transform_1, window_bounds = array<i64: 128, 128>}, {pipeline_mode = #tpu.pipeline_mode<synchronous>, transform_indices = @transform_2, window_bounds = array<i64: 1, 128>}, {pipeline_mode = #tpu.pipeline_mode<synchronous>, transform_indices = @transform_3, window_bounds = array<i64: 128, 128>}, {pipeline_mode = #tpu.pipeline_mode<synchronous>, transform_indices = @transform_4, window_bounds = array<i64: 1, 128>}, {transform_indices = @transform_5, window_bounds = array<i64: 16, 128>}]} {
    %c0 = arith.constant 0 : index
    %c0_0 = arith.constant 0 : index
    %0 = vector.load %arg1[%c0, %c0_0] : memref<16x128xbf16, #tpu.memory_space<vmem>>, vector<16x128xbf16>
    %c0_1 = arith.constant 0 : index
    %c0_2 = arith.constant 0 : index
    %1 = vector.load %arg2[%c0_1, %c0_2] : memref<128x128xbf16, #tpu.memory_space<vmem>>, vector<128x128xbf16>
    %cst = arith.constant dense<0.000000e+00> : vector<16x128xf32>
    %2 = tpu.matmul %0, %1, %cst {dimension_numbers = #tpu.dot_dimension_numbers<[1], [0], [0], [1], [0, 0, 1, 1], [], []>} : vector<16x128xbf16>, vector<128x128xbf16>, vector<16x128xf32> -> vector<16x128xf32>
    %c0_3 = arith.constant 0 : index
    %c0_4 = arith.constant 0 : index
    %3 = vector.load %arg3[%c0_3, %c0_4] : memref<1x128xf32, #tpu.memory_space<vmem>>, vector<1x128xf32>
    %4 = vector.broadcast %3 : vector<1x128xf32> to vector<16x128xf32>
    %5 = arith.addf %2, %4 : vector<16x128xf32>
    %cst_5 = arith.constant 0.000000e+00 : f32
    %6 = vector.broadcast %cst_5 : f32 to vector<16x128xf32>
    %7 = arith.maximumf %5, %6 : vector<16x128xf32>
    %8 = arith.truncf %7 : vector<16x128xf32> to vector<16x128xbf16>
    %c0_6 = arith.constant 0 : index
    %c0_7 = arith.constant 0 : index
    %9 = vector.load %arg4[%c0_6, %c0_7] : memref<128x128xbf16, #tpu.memory_space<vmem>>, vector<128x128xbf16>
    %cst_8 = arith.constant dense<0.000000e+00> : vector<16x128xf32>
    %10 = tpu.matmul %8, %9, %cst_8 {dimension_numbers = #tpu.dot_dimension_numbers<[1], [0], [0], [1], [0, 0, 1, 1], [], []>} : vector<16x128xbf16>, vector<128x128xbf16>, vector<16x128xf32> -> vector<16x128xf32>
    %c0_9 = arith.constant 0 : index
    %c0_10 = arith.constant 0 : index
    %11 = vector.load %arg5[%c0_9, %c0_10] : memref<1x128xf32, #tpu.memory_space<vmem>>, vector<1x128xf32>
    %12 = vector.broadcast %11 : vector<1x128xf32> to vector<16x128xf32>
    %13 = arith.addf %10, %12 : vector<16x128xf32>
    %c0_11 = arith.constant 0 : index
    %c0_12 = arith.constant 0 : index
    %14 = vector.load %arg6[%c0_11, %c0_12] : memref<16x128xf32, #tpu.memory_space<vmem>>, vector<16x128xf32>
    tpu.vector_store %arg6[%c0_11, %c0_12], %13 {strides = array<i32>} : memref<16x128xf32, #tpu.memory_space<vmem>>, vector<16x128xf32>,
    return
  }
  func.func @transform_0(%arg0: i32) -> (i32, i32) {
    %c0_i32 = arith.constant 0 : i32
    %c0_i32_0 = arith.constant 0 : i32
    return %arg0, %c0_i32 : i32, i32
  }
  func.func @transform_1(%arg0: i32) -> (i32, i32) {
    %c0_i32 = arith.constant 0 : i32
    %c0_i32_0 = arith.constant 0 : i32
    %c0_i32_1 = arith.constant 0 : i32
    return %c0_i32, %c0_i32_0 : i32, i32
  }
  func.func @transform_2(%arg0: i32) -> (i32, i32) {
    %c0_i32 = arith.constant 0 : i32
    %c0_i32_0 = arith.constant 0 : i32
    %c0_i32_1 = arith.constant 0 : i32
    return %c0_i32, %c0_i32_0 : i32, i32
  }
  func.func @transform_3(%arg0: i32) -> (i32, i32) {
    %c0_i32 = arith.constant 0 : i32
    %c0_i32_0 = arith.constant 0 : i32
    %c0_i32_1 = arith.constant 0 : i32
    return %c0_i32, %c0_i32_0 : i32, i32
  }
  func.func @transform_4(%arg0: i32) -> (i32, i32) {
    %c0_i32 = arith.constant 0 : i32
    %c0_i32_0 = arith.constant 0 : i32
    %c0_i32_1 = arith.constant 0 : i32
    return %c0_i32, %c0_i32_0 : i32, i32
  }
  func.func @transform_5(%arg0: i32) -> (i32, i32) {
    %c0_i32 = arith.constant 0 : i32
    %c0_i32_0 = arith.constant 0 : i32
    return %arg0, %c0_i32 : i32, i32
  }
}

</mosaic_0001>

<bundles_post_ra>
// kernel: ffn_apply.1
= control target key start
LH: loop header
LB: loop body
LE: loop exit
PB: predicated region body
PF: predicated region fallthrough
CT: control target
= control target key end

     0   :  { %10 = vsyncpa [#allocation3], 0  ;;  %s493_s0 = inlined_call_operand.vmem [shape: bf16[16,128], index: 0, kind: input, shape index: {}]   ;;  %s494_s1 = inlined_call_operand.hbm [shape: bf16[128,128], index: 1, kind: input, shape index: {}]   ;;  %s495_s2 = inlined_call_operand.vmem [shape: f32[1,128], index: 2, kind: input, shape index: {}]   ;;  %s496_s3 = inlined_call_operand.hbm [shape: bf16[128,128], index: 3, kind: input, shape index: {}]   ;;  %s497_s4 = inlined_call_operand.vmem [shape: f32[1,128], index: 4, kind: input, shape index: {}]   ;;  %s498_s5 = inlined_call_operand.vmem [shape: f32[16,128], index: 5, kind: output, shape index: {}]  }
   0x1   :  { %11 = vsyncpa [#allocation5], 0  ;;  %s436_s18 = smov [#allocation2]  }
   0x2   :  { %s19_s19 = sshll.u32 %s436_s18, 4  ;;  %s20_s19 = int_to_ptr.vmem [resolvable:$true] %s19_s19 }
   0x3   :  { %s400_s20 = scalar_lea.vmem %s20_s19, 1024  ;;  %p405_p1 = scmp.lt.s32.totalorder %s20_s19, %s20_s19 }
   0x4   :  { %p401_p0 = scmp.ne.s32.totalorder %s20_s19, %s400_s20  ;;  %p406_p2 = scmp.lt.s32.totalorder %s400_s20, %s400_s20 }
   0x6   :  { %p407_p3 = por %p406_p2, %p405_p1 }
   0x8   :  { %p408_p4 = pnand %p407_p3, %p401_p0 }
   0xa   :  { %411 = shalt.err (!%p408_p4)
}
   0xb   :  { %s437_s21 = smov 64   ;;  %s438_s22 = smov 4  }
   0xc   :  { %25 = dma.hbm_to_vmem [thread:$0]  %s494_s1, 1024, %s20_s19, [#allocation3], %s437_s21, %s437_s21, %s438_s22  }
   0xd   :  { %s439_s25 = smov [#allocation4]  }
   0xe   :  { %s33_s26 = sshll.u32 %s439_s25, 4  ;;  %s34_s26 = int_to_ptr.vmem [resolvable:$true] %s33_s26 }
   0xf   :  { %s420_s27 = scalar_lea.vmem %s34_s26, 1024  ;;  %p425_p6 = scmp.lt.s32.totalorder %s34_s26, %s34_s26 }
  0x10   :  { %p421_p5 = scmp.ne.s32.totalorder %s34_s26, %s420_s27  ;;  %p426_p7 = scmp.lt.s32.totalorder %s420_s27, %s420_s27 }
  0x12   :  { %p427_p8 = por %p426_p7, %p425_p6 }
  0x14   :  { %p428_p9 = pnand %p427_p8, %p421_p5 }
  0x16   :  { %431 = shalt.err (!%p428_p9)
}
  0x17   :  { %39 = dma.hbm_to_vmem [thread:$0]  %s496_s3, 1024, %s34_s26, [#allocation5], %s437_s21, %s437_s21, %s438_s22  }
  0x18   :  { %432 = dma.done.wait [#allocation3], 1024  }
  0x19   :  { %433 = vsyncadd [#allocation3], 4294966272 }
  0x1a   :  { %434 = dma.done.wait [#allocation5], 1024  }
  0x1b   :  { %435 = vsyncadd [#allocation5], 4294966272  ;;  %v440_v0 = vmov 0.0   ;;  %vm441_vm0 = vmmov 0   ;;  %v375_v1 = vld [vmem:[#allocation2 + $0x38] sm:$0xff]   ;;  %v376_v2 = vld [vmem:[#allocation2 + $0x30] sm:$0xff]  }
  0x1c   :  { %329 = vmatprep.subr.bf16.mxu0 %v440_v0  ;;  %345 = vmatprep.mubr.msk.bf16.mxu0 %vm441_vm0, %v440_v0  ;;  %v377_v3 = vld [vmem:[#allocation2 + $0x28] sm:$0xff]   ;;  %v384_v4 = vld [vmem:[#allocation4 + $0x38] sm:$0xff]   ;;  %v378_v5 = vld [vmem:[#allocation2 + $0x20] sm:$0xff]  }
  0x1d   :  { %349 = vmatprep.subr.bf16.mxu1 %v440_v0  ;;  %365 = vmatprep.mubr.msk.bf16.mxu1 %vm441_vm0, %v440_v0  ;;  %v385_v6 = vld [vmem:[#allocation4 + $0x30] sm:$0xff]   ;;  %v379_v7 = vld [vmem:[#allocation2 + $0x18] sm:$0xff]   ;;  %v386_v8 = vld [vmem:[#allocation4 + $0x28] sm:$0xff]  }
  0x1e   :  { %330 = vmatpush3.bf16.msra.mxu0 %v375_v1  ;;  %350 = vmatpush3.bf16.msra.mxu1 %v384_v4  ;;  %v380_v9 = vld [vmem:[#allocation2 + $0x10] sm:$0xff]   ;;  %v387_v10 = vld [vmem:[#allocation4 + $0x20] sm:$0xff]   ;;  %v381_v11 = vld [vmem:[#allocation2 + $0x8] sm:$0xff]  }
  0x1f   :  { %331 = vmatprep.subr.bf16.mxu0 %v440_v0  ;;  %351 = vmatprep.subr.bf16.mxu1 %v440_v0  ;;  %v388_v12 = vld [vmem:[#allocation4 + $0x18] sm:$0xff]   ;;  %v382_v13 = vld [vmem:[#allocation2] sm:$0xff]   ;;  %v389_v15 = vld [vmem:[#allocation4 + $0x10] sm:$0xff]  }
  0x20   :  { %v383_v14 = vld [vmem:[%s493_s0] sm:$0xff]   ;;  %v390_v16 = vld [vmem:[#allocation4 + $0x8] sm:$0xff]  }
  0x21   :  { %v391_v17 = vld [vmem:[#allocation4] sm:$0xff]  }
  0x22   :  { %332 = vmatpush3.bf16.msra.mxu0 %v376_v2  ;;  %352 = vmatpush3.bf16.msra.mxu1 %v385_v6  ;;  %v292_v18 = vld [vmem:[%s495_s2] ss:$0 sm:$0xff] }
  0x23   :  { %333 = vmatprep.subr.bf16.mxu0 %v440_v0  ;;  %353 = vmatprep.subr.bf16.mxu1 %v440_v0  ;;  %v302_v28 = vld [vmem:[%s497_s4] ss:$0 sm:$0xff] }
  0x26   :  { %334 = vmatpush3.bf16.msra.mxu0 %v377_v3  ;;  %354 = vmatpush3.bf16.msra.mxu1 %v386_v8 }
  0x27   :  { %335 = vmatprep.subr.bf16.mxu0 %v440_v0  ;;  %355 = vmatprep.subr.bf16.mxu1 %v440_v0 }
  0x2a   :  { %336 = vmatpush3.bf16.msra.mxu0 %v378_v5  ;;  %356 = vmatpush3.bf16.msra.mxu1 %v387_v10 }
  0x2b   :  { %337 = vmatprep.subr.bf16.mxu0 %v440_v0  ;;  %357 = vmatprep.subr.bf16.mxu1 %v440_v0 }
  0x2e   :  { %338 = vmatpush3.bf16.msra.mxu0 %v379_v7  ;;  %358 = vmatpush3.bf16.msra.mxu1 %v388_v12 }
  0x2f   :  { %339 = vmatprep.subr.bf16.mxu0 %v440_v0  ;;  %359 = vmatprep.subr.bf16.mxu1 %v440_v0 }
  0x32   :  { %340 = vmatpush3.bf16.msra.mxu0 %v380_v9  ;;  %360 = vmatpush3.bf16.msra.mxu1 %v389_v15 }
  0x33   :  { %341 = vmatprep.subr.bf16.mxu0 %v440_v0  ;;  %361 = vmatprep.subr.bf16.mxu1 %v440_v0 }
  0x36   :  { %342 = vmatpush3.bf16.msra.mxu0 %v381_v11  ;;  %362 = vmatpush3.bf16.msra.mxu1 %v390_v16 }
  0x37   :  { %343 = vmatprep.subr.bf16.mxu0 %v440_v0  ;;  %363 = vmatprep.subr.bf16.mxu1 %v440_v0 }
  0x3a   :  { %344 = vmatpush3.bf16.msra.mxu0 %v382_v13  ;;  %364 = vmatpush3.bf16.msra.mxu1 %v391_v17 }
  0x3d   :  { %346 = vmatmul.mubr.bf16.vlgmr.msra.gmra.mxu0 %v383_v14 }
  0xfd   :  { %v162_v19 = vpop.f32.mrf.mxu0 }
  0xfe   :  { %v163_v21 = vadd.f32 %v292_v18, %v162_v19 }
  0xff   :  { %v347_v20 = vpop.f32.mrf.mxu0 }
 0x100   :  { %v169_v25 = vmax.f32 %v163_v21, 0.0 }
 0x101   :  { %v165_v22 = vpop.f32.mrf.mxu0 }
 0x102   :  { %v166_v23 = vadd.f32 %v292_v18, %v165_v22 }
 0x103   :  { %v348_v24 = vpop.f32.mrf.mxu0 }
 0x104   :  { %v170_v26 = vmax.f32 %v166_v23, 0.0 }
 0x106   :  { %v171_v27 = vpack.c.bf16 %v170_v26, %v169_v25 }
 0x108   :  { %366 = vmatmul.mubr.bf16.vlgmr.msra.gmra.mxu1 %v171_v27 }
 0x1c8   :  { %v277_v29 = vpop.f32.mrf.mxu1 }
 0x1c9   :  { %v278_v30 = vadd.f32 %v302_v28, %v277_v29 }
 0x1ca   :  { %v367_v31 = vpop.f32.mrf.mxu1 }
 0x1cb   :  { %284 = vst [vmem:[%s498_s5] sm:$0xff] %v278_v30 }
 0x1cc   :  { %v280_v32 = vpop.f32.mrf.mxu1 }
 0x1cd   :  { %v281_v33 = vadd.f32 %v302_v28, %v280_v32 }
 0x1ce   :  { %v368_v34 = vpop.f32.mrf.mxu1 }
 0x1cf   :  { %285 = vst [vmem:[%s498_s5 + $0x8] sm:$0xff] %v281_v33 }
 0x1d0   :  { %290 = vsyncpa [#allocation3], 1 }
 0x1d1   :  { %291 = vsyncpa [#allocation5], 1 }

</bundles_post_ra>
